<compile_context>
chip_gen: v5e
topology: v5e:2x2
jax: 0.10.0
libtpu: 0.0.40
codegen_flags: <defaults>
</compile_context>

<pallas_src>
import jax
import jax.numpy as jnp
from jax import lax
from jax.experimental import pallas as pl
from jax.experimental.pallas import tpu as pltpu


def cbow_kernel(ctx_ref, w_ref, b_ref, o_ref):
    # ctx_ref: (tb, E)  bf16   batch tile of the context-mean activations
    # w_ref  : (tv, E)  bf16   vocab tile of the linear weight (un-transposed)
    # b_ref  : (1, tv)  f32    vocab tile of the bias
    # o_ref  : (tb, tv) f32    output logits tile
    acc = lax.dot_general(
        ctx_ref[...], w_ref[...],
        dimension_numbers=(((1,), (1,)), ((), ())),   # contract over E (trans-B)
        preferred_element_type=jnp.float32,
    )
    o_ref[...] = acc + b_ref[...]


def _round_up(n, m):
    return ((n + m - 1) // m) * m


def _pick_tiles(B, E, V, vmem_budget_bytes=24 << 20):
    """Pick (tb, tv) tiles: 8/128 aligned, sized against a v7x-safe VMEM budget."""
    tb = min(256, _round_up(B, 8))
    tv = min(2048, _round_up(V, 128))

    def vmem_bytes(tb_, tv_):
        w = 2 * tv_ * E * 2        # bf16 weight tile, double buffered
        a = 2 * tb_ * E * 2        # bf16 activation tile, double buffered
        b = 2 * tv_ * 4            # f32 bias tile, double buffered
        o = 2 * tb_ * tv_ * 4      # f32 output tile, double buffered
        return w + a + b + o

    while tv > 128 and vmem_bytes(tb, tv) > vmem_budget_bytes:
        tv //= 2
    return tb, tv


def cbow_forward(x, emb_table, lin_w, lin_b):
    """x: int (..., C); emb_table: (V, E); lin_w: (V, E); lin_b: (V,). Returns (B, V) f32."""
    C = x.shape[-1]
    x2 = x.reshape(-1, C)                               # (B, C)
    B = x2.shape[0]
    V, E = emb_table.shape

    # Glue: embedding gather + context mean, fused by XLA (hoisted out of kernel).
    ctx_mean = jnp.take(emb_table, x2, axis=0).mean(axis=1)       # (B, E) f32
    ctx_mean = ctx_mean.astype(jnp.bfloat16)                      # stream as bf16
    w_bf16 = lin_w.astype(jnp.bfloat16)                           # (V, E) bf16, no transpose
    b_f32 = lin_b.astype(jnp.float32)                             # (V,)   f32

    tb, tv = _pick_tiles(B, E, V)
    Bp = _round_up(B, tb)
    Vp = _round_up(V, tv)

    # Zero-pad to tile multiples (tail tiles are fully written, then sliced off).
    if Bp != B:
        ctx_mean = jnp.pad(ctx_mean, ((0, Bp - B), (0, 0)))
    if Vp != V:
        w_bf16 = jnp.pad(w_bf16, ((0, Vp - V), (0, 0)))
        b_f32 = jnp.pad(b_f32, (0, Vp - V))
    b2 = b_f32.reshape(1, Vp)

    grid = (Bp // tb, Vp // tv)
    out = pl.pallas_call(
        cbow_kernel,
        out_shape=jax.ShapeDtypeStruct((Bp, Vp), jnp.float32),
        grid_spec=pltpu.PrefetchScalarGridSpec(
            num_scalar_prefetch=0,
            grid=grid,
            in_specs=[
                pl.BlockSpec((tb, E), lambda i, j: (i, 0)),    # ctx_mean batch tile
                pl.BlockSpec((tv, E), lambda i, j: (j, 0)),    # weight vocab tile (V, E)
                pl.BlockSpec((1, tv), lambda i, j: (0, j)),    # bias vocab tile
            ],
            out_specs=pl.BlockSpec((tb, tv), lambda i, j: (i, j)),
        ),
        compiler_params=pltpu.CompilerParams(
            dimension_semantics=("parallel", "parallel"),
        ),
    )(ctx_mean, w_bf16, b2)

    return out[:B, :V]


if __name__ == "__main__":
    # Small, forward-consistent shapes.
    vocab_size = 512        # V
    embedding_dim = 64      # E
    context_len = 4         # C
    batch_shape = (2, 4)    # leading dims collapsed by view(-1, C) -> B = 8

    key = jax.random.PRNGKey(0)
    k_emb, k_w, k_b, k_x = jax.random.split(key, 4)

    # Deterministic parameter init (synthetic; no checkpoint loading).
    emb_table = jax.random.normal(k_emb, (vocab_size, embedding_dim), jnp.float32) * 0.1
    lin_w = jax.random.normal(k_w, (vocab_size, embedding_dim), jnp.float32) * 0.1
    lin_b = jax.random.normal(k_b, (vocab_size,), jnp.float32) * 0.01

    # Integer context-word indices.
    x = jax.random.randint(k_x, batch_shape + (context_len,), 0, vocab_size, jnp.int32)

    out = jax.block_until_ready(cbow_forward(x, emb_table, lin_w, lin_b))

    # Pure-JAX f32 reference of the PyTorch forward.
    x2 = x.reshape(-1, context_len)
    ref = jnp.take(emb_table, x2, axis=0).mean(axis=1) @ lin_w.T + lin_b

    assert out.shape == (x2.shape[0], vocab_size), out.shape
    # bf16-streamed weights/activations with f32 accumulation -> looser tolerance.
    assert jnp.allclose(out, ref, atol=2e-2, rtol=2e-2), "mismatch vs reference"
    print("KERNEL_OK")
</pallas_src>

<mosaic_0001>
module attributes {stable_mosaic.version = 11 : i64} {
  func.func @cbow_kernel(%arg0: i32, %arg1: i32, %arg2: memref<8x64xbf16, #tpu.memory_space<vmem>>, %arg3: memref<512x64xbf16, #tpu.memory_space<vmem>>, %arg4: memref<1x512xf32, #tpu.memory_space<vmem>>, %arg5: memref<8x512xf32, #tpu.memory_space<vmem>>) attributes {dimension_semantics = [#tpu.dimension_semantics<parallel>, #tpu.dimension_semantics<parallel>], iteration_bounds = array<i64: 1, 1>, scalar_prefetch = 0 : i64, scratch_operands = 0 : i64, tpu.core_type = #tpu.core_type<tc>, window_params = [{transform_indices = @transform_0, window_bounds = array<i64: 8, 64>}, {transform_indices = @transform_1, window_bounds = array<i64: 512, 64>}, {transform_indices = @transform_2, window_bounds = array<i64: 1, 512>}, {transform_indices = @transform_3, window_bounds = array<i64: 8, 512>}]} {
    %c0 = arith.constant 0 : index
    %c0_0 = arith.constant 0 : index
    %0 = vector.load %arg2[%c0, %c0_0] : memref<8x64xbf16, #tpu.memory_space<vmem>>, vector<8x64xbf16>
    %c0_1 = arith.constant 0 : index
    %c0_2 = arith.constant 0 : index
    %1 = vector.load %arg3[%c0_1, %c0_2] : memref<512x64xbf16, #tpu.memory_space<vmem>>, vector<512x64xbf16>
    %cst = arith.constant dense<0.000000e+00> : vector<8x512xf32>
    %2 = tpu.matmul %0, %1, %cst {dimension_numbers = #tpu.dot_dimension_numbers<[1], [1], [0], [0], [0, 0, 1, 0], [], []>} : vector<8x64xbf16>, vector<512x64xbf16>, vector<8x512xf32> -> vector<8x512xf32>
    %c0_3 = arith.constant 0 : index
    %c0_4 = arith.constant 0 : index
    %3 = vector.load %arg4[%c0_3, %c0_4] : memref<1x512xf32, #tpu.memory_space<vmem>>, vector<1x512xf32>
    %4 = vector.broadcast %3 : vector<1x512xf32> to vector<8x512xf32>
    %5 = arith.addf %2, %4 : vector<8x512xf32>
    %c0_5 = arith.constant 0 : index
    %c0_6 = arith.constant 0 : index
    %6 = vector.load %arg5[%c0_5, %c0_6] : memref<8x512xf32, #tpu.memory_space<vmem>>, vector<8x512xf32>
    tpu.vector_store %arg5[%c0_5, %c0_6], %5 {strides = array<i32>} : memref<8x512xf32, #tpu.memory_space<vmem>>, vector<8x512xf32>,
    return
  }
  func.func @transform_0(%arg0: i32, %arg1: i32) -> (i32, i32) {
    %c0_i32 = arith.constant 0 : i32
    %c0_i32_0 = arith.constant 0 : i32
    return %arg0, %c0_i32 : i32, i32
  }
  func.func @transform_1(%arg0: i32, %arg1: i32) -> (i32, i32) {
    %c0_i32 = arith.constant 0 : i32
    %c0_i32_0 = arith.constant 0 : i32
    return %arg1, %c0_i32 : i32, i32
  }
  func.func @transform_2(%arg0: i32, %arg1: i32) -> (i32, i32) {
    %c0_i32 = arith.constant 0 : i32
    %c0_i32_0 = arith.constant 0 : i32
    return %c0_i32, %arg1 : i32, i32
  }
  func.func @transform_3(%arg0: i32, %arg1: i32) -> (i32, i32) {
    %c0_i32 = arith.constant 0 : i32
    return %arg0, %arg1 : i32, i32
  }
}

</mosaic_0001>

<bundles_post_ra>
// kernel: tpu_custom_call.1
= control target key start
LH: loop header
LB: loop body
LE: loop exit
PB: predicated region body
PF: predicated region fallthrough
CT: control target
= control target key end

     0   :  { %vm250_vm0 = vcmask 523264   ;;  %s775_s0 = inlined_call_operand.vmem [shape: bf16[8,64], index: 0, kind: input, shape index: {}]   ;;  %s776_s1 = inlined_call_operand.vmem [shape: bf16[512,64], index: 1, kind: input, shape index: {}]   ;;  %s777_s2 = inlined_call_operand.vmem [shape: f32[1,512], index: 2, kind: input, shape index: {}]   ;;  %s778_s3 = inlined_call_operand.hbm [shape: f32[8,512], index: 3, kind: output, shape index: {}]  }
   0x1   :  { %v561_v0 = vld [vmem:[%s776_s1 + $0x38] sm:$0xff]  ;;  %v560_v8 = vld [vmem:[%s776_s1 + $0x30] sm:$0xff] }
   0x2   :  { %v569_v1 = vld [vmem:[%s776_s1 + $0x78] sm:$0xff]  ;;  %v276_v4 = vsel %vm250_vm0, %v561_v0, 0  ;;  %v568_v9 = vld [vmem:[%s776_s1 + $0x70] sm:$0xff] }
   0x3   :  { %v577_v2 = vld [vmem:[%s776_s1 + $0xb8] sm:$0xff]  ;;  %v300_v5 = vsel %vm250_vm0, %v569_v1, 0  ;;  %350 = vmatpush.bf16.xpose.msra.mxu0 %v276_v4  ;;  %v576_v10 = vld [vmem:[%s776_s1 + $0xb0] sm:$0xff] }
   0x4   :  { %v585_v3 = vld [vmem:[%s776_s1 + $0xf8] sm:$0xff]  ;;  %v324_v6 = vsel %vm250_vm0, %v577_v2, 0  ;;  %363 = vmatpush.bf16.xpose.msra.mxu1 %v300_v5  ;;  %v584_v11 = vld [vmem:[%s776_s1 + $0xf0] sm:$0xff] }
   0x5   :  { %v348_v7 = vsel %vm250_vm0, %v585_v3, 0  ;;  %376 = vmatpush.bf16.xpose.msra.mxu2 %v324_v6 }
   0x6   :  { %389 = vmatpush.bf16.xpose.msra.mxu3 %v348_v7 }
   0x7   :  { %8 = vsyncpa [#allocation3], 0  ;;  %v273_v12 = vsel %vm250_vm0, %v560_v8, 0  ;;  %v297_v13 = vsel %vm250_vm0, %v568_v9, 0  ;;  %v321_v14 = vsel %vm250_vm0, %v576_v10, 0  ;;  %v345_v15 = vsel %vm250_vm0, %v584_v11, 0 }
   0x8   :  { %v559_v16 = vld [vmem:[%s776_s1 + $0x28] sm:$0xff]  ;;  %v558_v24 = vld [vmem:[%s776_s1 + $0x20] sm:$0xff]  ;;  %v557_v32 = vld [vmem:[%s776_s1 + $0x18] sm:$0xff]  ;;  %s413_s28 = sshll.u32 %s778_s3, 4  ;;  %s414_s28 = int_to_ptr.hbm [resolvable:$true] %s413_s28 }
   0x9   :  { %v567_v17 = vld [vmem:[%s776_s1 + $0x68] sm:$0xff]  ;;  %v270_v20 = vsel %vm250_vm0, %v559_v16, 0  ;;  %v566_v25 = vld [vmem:[%s776_s1 + $0x60] sm:$0xff]  ;;  %v267_v28 = vsel %vm250_vm0, %v558_v24, 0  ;;  %v565_v33 = vld [vmem:[%s776_s1 + $0x58] sm:$0xff]  ;;  %v264_v36 = vsel %vm250_vm0, %v557_v32, 0 }
   0xa   :  { %v575_v18 = vld [vmem:[%s776_s1 + $0xa8] sm:$0xff]  ;;  %v294_v21 = vsel %vm250_vm0, %v567_v17, 0  ;;  %v574_v26 = vld [vmem:[%s776_s1 + $0xa0] sm:$0xff]  ;;  %v291_v29 = vsel %vm250_vm0, %v566_v25, 0  ;;  %v573_v34 = vld [vmem:[%s776_s1 + $0x98] sm:$0xff]  ;;  %v288_v37 = vsel %vm250_vm0, %v565_v33, 0 }
   0xb   :  { %351 = vmatpush.bf16.xpose.msra.mxu0 %v273_v12  ;;  %v583_v19 = vld [vmem:[%s776_s1 + $0xe8] sm:$0xff]  ;;  %v318_v22 = vsel %vm250_vm0, %v575_v18, 0  ;;  %v582_v27 = vld [vmem:[%s776_s1 + $0xe0] sm:$0xff]  ;;  %v315_v30 = vsel %vm250_vm0, %v574_v26, 0  ;;  %v581_v35 = vld [vmem:[%s776_s1 + $0xd8] sm:$0xff]  ;;  %v312_v38 = vsel %vm250_vm0, %v573_v34, 0 }
   0xc   :  { %364 = vmatpush.bf16.xpose.msra.mxu1 %v297_v13  ;;  %v342_v23 = vsel %vm250_vm0, %v583_v19, 0  ;;  %v339_v31 = vsel %vm250_vm0, %v582_v27, 0  ;;  %v336_v39 = vsel %vm250_vm0, %v581_v35, 0  ;;  %v556_v40 = vld [vmem:[%s776_s1 + $0x10] sm:$0xff]  ;;  %v555_v48 = vld [vmem:[%s776_s1 + $0x8] sm:$0xff]  ;;  %v554_v56 = vld [vmem:[%s776_s1] sm:$0xff] }
   0xd   :  { %377 = vmatpush.bf16.xpose.msra.mxu2 %v321_v14  ;;  %v564_v41 = vld [vmem:[%s776_s1 + $0x50] sm:$0xff]  ;;  %v261_v44 = vsel %vm250_vm0, %v556_v40, 0  ;;  %v563_v49 = vld [vmem:[%s776_s1 + $0x48] sm:$0xff]  ;;  %v258_v52 = vsel %vm250_vm0, %v555_v48, 0  ;;  %v562_v57 = vld [vmem:[%s776_s1 + $0x40] sm:$0xff]  ;;  %v255_v60 = vsel %vm250_vm0, %v554_v56, 0 }
   0xe   :  { %390 = vmatpush.bf16.xpose.msra.mxu3 %v345_v15  ;;  %v572_v42 = vld [vmem:[%s776_s1 + $0x90] sm:$0xff]  ;;  %v285_v45 = vsel %vm250_vm0, %v564_v41, 0  ;;  %v571_v50 = vld [vmem:[%s776_s1 + $0x88] sm:$0xff]  ;;  %v282_v53 = vsel %vm250_vm0, %v563_v49, 0  ;;  %v570_v58 = vld [vmem:[%s776_s1 + $0x80] sm:$0xff]  ;;  %v279_v61 = vsel %vm250_vm0, %v562_v57, 0 }
   0xf   :  { %v580_v43 = vld [vmem:[%s776_s1 + $0xd0] sm:$0xff]  ;;  %v309_v46 = vsel %vm250_vm0, %v572_v42, 0  ;;  %v579_v51 = vld [vmem:[%s776_s1 + $0xc8] sm:$0xff]  ;;  %v306_v54 = vsel %vm250_vm0, %v571_v50, 0  ;;  %v578_v59 = vld [vmem:[%s776_s1 + $0xc0] sm:$0xff]  ;;  %v303_v62 = vsel %vm250_vm0, %v570_v58, 0 }
  0x10   :  { %v333_v47 = vsel %vm250_vm0, %v580_v43, 0  ;;  %v330_v55 = vsel %vm250_vm0, %v579_v51, 0  ;;  %v327_v63 = vsel %vm250_vm0, %v578_v59, 0  ;;  %v15_v0 = vld [vmem:[%s775_s0] sm:$0xf]  ;;  %s613_s0 = smov [#allocation2]  }
  0x11   :  { %v80_v1 = vld [vmem:[%s777_s2] sm:$0xf]  ;;  %s411_s25 = sshll.u32 %s613_s0, 4  ;;  %s412_s25 = int_to_ptr.vmem [resolvable:$true] %s411_s25 }
  0x12   :  { %v82_v2 = vperm.slane %v80_v1, 0  ;;  %v83_v3 = vperm.slane %v80_v1, 1  ;;  %v84_v8 = vperm.slane %v80_v1, 2  ;;  %v85_v9 = vperm.slane %v80_v1, 3 }
  0x13   :  { %352 = vmatpush.bf16.xpose.msra.mxu0 %v270_v20 }
  0x14   :  { %365 = vmatpush.bf16.xpose.msra.mxu1 %v294_v21 }
  0x15   :  { %378 = vmatpush.bf16.xpose.msra.mxu2 %v318_v22 }
  0x16   :  { %391 = vmatpush.bf16.xpose.msra.mxu3 %v342_v23 }
  0x1b   :  { %353 = vmatpush.bf16.xpose.msra.mxu0 %v267_v28 }
  0x1c   :  { %366 = vmatpush.bf16.xpose.msra.mxu1 %v291_v29 }
  0x1d   :  { %379 = vmatpush.bf16.xpose.msra.mxu2 %v315_v30 }
  0x1e   :  { %392 = vmatpush.bf16.xpose.msra.mxu3 %v339_v31 }
  0x23   :  { %354 = vmatpush.bf16.xpose.msra.mxu0 %v264_v36 }
  0x24   :  { %367 = vmatpush.bf16.xpose.msra.mxu1 %v288_v37 }
  0x25   :  { %380 = vmatpush.bf16.xpose.msra.mxu2 %v312_v38 }
  0x26   :  { %393 = vmatpush.bf16.xpose.msra.mxu3 %v336_v39 }
  0x2b   :  { %355 = vmatpush.bf16.xpose.msra.mxu0 %v261_v44 }
  0x2c   :  { %368 = vmatpush.bf16.xpose.msra.mxu1 %v285_v45 }
  0x2d   :  { %381 = vmatpush.bf16.xpose.msra.mxu2 %v309_v46 }
  0x2e   :  { %394 = vmatpush.bf16.xpose.msra.mxu3 %v333_v47 }
  0x33   :  { %356 = vmatpush.bf16.xpose.msra.mxu0 %v258_v52 }
  0x34   :  { %369 = vmatpush.bf16.xpose.msra.mxu1 %v282_v53 }
  0x35   :  { %382 = vmatpush.bf16.xpose.msra.mxu2 %v306_v54 }
  0x36   :  { %395 = vmatpush.bf16.xpose.msra.mxu3 %v330_v55 }
  0x3b   :  { %357 = vmatpush.bf16.xpose.msra.mxu0 %v255_v60 }
  0x3c   :  { %370 = vmatpush.bf16.xpose.msra.mxu1 %v279_v61 }
  0x3d   :  { %383 = vmatpush.bf16.xpose.msra.mxu2 %v303_v62 }
  0x3e   :  { %396 = vmatpush.bf16.xpose.msra.mxu3 %v327_v63 }
  0x42   :  { %550 = vmatmul.msk.bf16.vlgmr.msra.gmra.mxu0 %vm250_vm0, %v15_v0 }
  0x43   :  { %551 = vmatmul.msk.bf16.vlgmr.msra.gmra.mxu1 %vm250_vm0, %v15_v0 }
  0x44   :  { %552 = vmatmul.msk.bf16.vlgmr.msra.gmra.mxu2 %vm250_vm0, %v15_v0 }
  0x45   :  { %553 = vmatmul.msk.bf16.vlgmr.msra.gmra.mxu3 %vm250_vm0, %v15_v0 }
  0xbf   :  { %v359_v4 = vpop.f32.mrf.mxu0 }
  0xc0   :  { %v372_v5 = vpop.f32.mrf.mxu1  ;;  %v360_v6 = vadd.f32 %v359_v4, %v82_v2 }
  0xc1   :  { %v373_v7 = vadd.f32 %v372_v5, %v83_v3 }
  0xc2   :  { %402 = vst [vmem:[#allocation2] sm:$0xff] %v360_v6 }
  0xc3   :  { %403 = vst [vmem:[#allocation2 + $0x8] sm:$0xff] %v373_v7 }
  0xc7   :  { %v385_v10 = vpop.f32.mrf.mxu2  ;;  %v361_v14 = vpop.f32.mrf.mxu0 }
  0xc8   :  { %v398_v11 = vpop.f32.mrf.mxu3  ;;  %v386_v12 = vadd.f32 %v385_v10, %v84_v8  ;;  %v374_v15 = vpop.f32.mrf.mxu1 }
  0xc9   :  { %v399_v13 = vadd.f32 %v398_v11, %v85_v9 }
  0xca   :  { %404 = vst [vmem:[#allocation2 + $0x10] sm:$0xff] %v386_v12 }
  0xcb   :  { %405 = vst [vmem:[#allocation2 + $0x18] sm:$0xff] %v399_v13 }
  0xcc   :  { %416 = dma.vmem_to_hbm [thread:$0]  %s412_s25, 512, %s414_s28, [#allocation3]  }
  0xcf   :  { %v387_v16 = vpop.f32.mrf.mxu2 }
  0xd0   :  { %v400_v17 = vpop.f32.mrf.mxu3 }
  0xd1   :  { %611 = dma.done.wait [#allocation3], 512  }
  0xd2   :  { %612 = vsyncadd [#allocation3], 4294966784 }
  0xd3   :  { %421 = vsyncpa [#allocation3], 1 }

</bundles_post_ra>
